<compile_context>
chip_gen: v6e
topology: v6e:2x2x1
jax: 0.10.0
libtpu: 0.0.40
codegen_flags: <defaults>
</compile_context>

<pallas_src>
import functools

import jax
import jax.numpy as jnp
from jax import lax
from jax.experimental import pallas as pl
from jax.experimental.pallas import tpu as pltpu


def _round_up(x, m):
    return ((x + m - 1) // m) * m


def _pick_tm(batch, tm_max=512):
    """Batch tile: >=2 grid steps when batch allows, MXU-aligned, capped."""
    if batch <= 16:
        return batch                       # single tiny tile; block == full dim
    half = _round_up(-(-batch // 2), 8)    # aim for at least 2 grid steps
    tm = min(tm_max, half)
    for align in (256, 128):               # MXU alignment: 256 (v6e/v7x), 128 (v5e)
        if tm >= align:
            return (tm // align) * align
    return tm                              # already a multiple of 8


def mlp_kernel(x_ref, w0_ref, b0_ref, wh_ref, bh_ref, wf_ref, bf_ref, o_ref,
               *, hidden_layers):
    # hidden0: Linear(input_num, units) -> Dropout(identity) -> ReLU
    # x arrives f32; cast to bf16 in-kernel (VPU slot, hidden under DMA) so the
    # wrapper does not burn an extra HBM pass on the cast.  f32 accumulation.
    x_bf = x_ref[...].astype(jnp.bfloat16)
    h = jnp.dot(x_bf, w0_ref[...], preferred_element_type=jnp.float32)
    h = jnp.maximum(h + b0_ref[...], 0.0)

    # Shared hidden block applied `hidden_layers` times with the SAME weights,
    # exactly like the PyTorch module reusing self.hidden.  Hoist weight/bias
    # loads out of the (unrolled) loop body.
    wh = wh_ref[...]
    bh = bh_ref[...]

    def body(_, h):
        hb = jnp.dot(h.astype(jnp.bfloat16), wh,
                     preferred_element_type=jnp.float32)
        return jnp.maximum(hb + bh, 0.0)

    # hidden_layers is a compile-time Python int: always unroll the dependent
    # dot -> bias -> ReLU chain (visible non-unrolled loops measure ~35% slower).
    h = lax.fori_loop(0, hidden_layers, body, h, unroll=True)

    # fc: Linear(units, 2) — weights zero-padded to 128 output lanes, so the
    # store is a full-lane vst (lane-dense).
    out = jnp.dot(h.astype(jnp.bfloat16), wf_ref[...],
                  preferred_element_type=jnp.float32) + bf_ref[...]
    o_ref[...] = out.astype(o_ref.dtype)


def prepare_params(params, *, lane=128):
    """One-time parameter prep (do this at init time, not per forward call).

    Zero-pads the hidden/output feature dims to full 128-lane tiles so w0/wh/wf
    and the h intermediate are lane-dense, and casts matmul weights to bf16
    (biases stay f32).  Padding is numerically exact: padded hidden channels
    are ReLU(0 + 0) = 0 and the corresponding padded weight rows are 0.
    """
    w0, b0, wh, bh, wf, bf = params
    input_num, units = w0.shape
    out_dim = wf.shape[1]
    units_p = _round_up(max(units, lane), lane)
    out_p = _round_up(max(out_dim, lane), lane)

    w0_p = jnp.zeros((input_num, units_p), jnp.float32).at[:, :units].set(w0)
    b0_p = jnp.zeros((1, units_p), jnp.float32).at[:, :units].set(
        jnp.reshape(b0, (1, -1)))
    wh_p = jnp.zeros((units_p, units_p), jnp.float32).at[:units, :units].set(wh)
    bh_p = jnp.zeros((1, units_p), jnp.float32).at[:, :units].set(
        jnp.reshape(bh, (1, -1)))
    wf_p = jnp.zeros((units_p, out_p), jnp.float32).at[:units, :out_dim].set(wf)
    bf_p = jnp.zeros((1, out_p), jnp.float32).at[:, :out_dim].set(
        jnp.reshape(bf, (1, -1)))

    prepared = (w0_p.astype(jnp.bfloat16), b0_p,
                wh_p.astype(jnp.bfloat16), bh_p,
                wf_p.astype(jnp.bfloat16), bf_p)
    return prepared, out_dim


def mlp_forward(x, prepared_params, hidden_layers, out_dim, *, tm_max=512):
    """Eval-mode MLP forward. x: (batch, input_num) f32. Returns (batch, out_dim) f32."""
    w0, b0, wh, bh, wf, bf = prepared_params
    batch, input_num = x.shape
    units_p = w0.shape[1]
    out_pad = wf.shape[1]

    # --- batch tiling: ragged grid (no wrapper pad), >=2 steps when possible --
    tm = _pick_tm(batch, tm_max)
    grid = (pl.cdiv(batch, tm),)

    const = lambda i: (0, 0)  # weights/biases: same block every step (resident)
    kernel = functools.partial(mlp_kernel, hidden_layers=hidden_layers)

    # --- VMEM sizing (bytes): weights * buffers + 2x activation tiles + h -----
    bytes_w = 2 * (w0.size + wh.size + wf.size) + 4 * (b0.size + bh.size + bf.size)
    bytes_tiles = 4 * tm * (input_num + out_pad)   # f32 x-tile + f32 out-tile
    bytes_h = 4 * tm * units_p                     # f32 intermediate

    def build(single_buffer_weights):
        if single_buffer_weights:
            # Constant index_map => the second pipeline buffer is never used;
            # single-buffer the resident weights (halves weight VMEM on v7x).
            wspec = lambda shape: pl.BlockSpec(shape, const,
                                               pipeline_mode=pl.Buffered(1))
            wbufs = 1
        else:
            wspec = lambda shape: pl.BlockSpec(shape, const)
            wbufs = 2
        est = wbufs * bytes_w + 2 * bytes_tiles + 4 * bytes_h
        vmem_limit = int(min(max(2 * est, 32 * 2**20), 64 * 2**20))
        return pl.pallas_call(
            kernel,
            out_shape=jax.ShapeDtypeStruct((batch, out_pad), jnp.float32),
            grid_spec=pltpu.PrefetchScalarGridSpec(
                num_scalar_prefetch=0,
                grid=grid,
                in_specs=[
                    pl.BlockSpec((tm, input_num), lambda i: (i, 0)),   # x (tiled, f32)
                    wspec((input_num, units_p)),                       # w0 (bf16)
                    wspec((1, units_p)),                               # b0 (f32)
                    wspec((units_p, units_p)),                         # wh (bf16)
                    wspec((1, units_p)),                               # bh (f32)
                    wspec((units_p, out_pad)),                         # wf (bf16, padded)
                    wspec((1, out_pad)),                               # bf (f32, padded)
                ],
                out_specs=pl.BlockSpec((tm, out_pad), lambda i: (i, 0)),
            ),
            compiler_params=pltpu.CompilerParams(
                dimension_semantics=("parallel",),   # megacore split on v7x
                vmem_limit_bytes=vmem_limit),
        )

    try:
        out_p = build(True)(x, w0, b0, wh, bh, wf, bf)
    except Exception:
        # Feature-detect fallback: some JAX versions reject pipeline_mode /
        # Buffered(1) on pallas_call BlockSpecs; retry with default buffering.
        out_p = build(False)(x, w0, b0, wh, bh, wf, bf)

    return out_p[:, :out_dim]


def init_linear(key, fan_in, fan_out):
    # Deterministic init mimicking nn.Linear's uniform(-1/sqrt(fan_in), 1/sqrt(fan_in)).
    kw, kb = jax.random.split(key)
    bound = 1.0 / jnp.sqrt(jnp.float32(fan_in))
    w = jax.random.uniform(kw, (fan_in, fan_out), jnp.float32, -bound, bound)
    b = jax.random.uniform(kb, (1, fan_out), jnp.float32, -bound, bound)
    return w, b


if __name__ == "__main__":
    # Small shapes consistent with the module's forward.
    batch = 8
    input_num = 32
    units = 32
    hidden_layers = 2
    dropout = 0.1  # unused at inference (identity)

    key = jax.random.PRNGKey(0)
    kx, k0, kh, kf = jax.random.split(key, 4)

    x = jax.random.normal(kx, (batch, input_num), jnp.float32)
    w0, b0 = init_linear(k0, input_num, units)
    wh, bh = init_linear(kh, units, units)
    wf, bf = init_linear(kf, units, 2)
    params = (w0, b0, wh, bh, wf, bf)

    # One-time parameter prep (lane-dense padding + bf16 cast).
    prepared, out_dim = prepare_params(params)

    out = mlp_forward(x, prepared, hidden_layers, out_dim)
    jax.block_until_ready(out)

    # Pure-JAX reference of the same eval-mode forward with identical bf16
    # operand quantization (bf16 products are exact in f32; only accumulation
    # order differs, and the zero-padding contributes exactly 0).
    q = lambda a: a.astype(jnp.bfloat16).astype(jnp.float32)
    h = jnp.maximum(q(x) @ q(w0) + b0, 0.0)
    for _ in range(hidden_layers):
        h = jnp.maximum(q(h) @ q(wh) + bh, 0.0)
    ref = q(h) @ q(wf) + bf

    assert out.shape == (batch, 2)
    assert jnp.allclose(out, ref, atol=2e-3, rtol=2e-3), (
        jnp.max(jnp.abs(out - ref)))

    print("KERNEL_OK")
</pallas_src>

<mosaic_0001>
module attributes {stable_mosaic.version = 11 : i64} {
  func.func @mlp_kernel(%arg0: i32, %arg1: memref<8x32xf32, #tpu.memory_space<vmem>>, %arg2: memref<32x128xbf16, #tpu.memory_space<vmem>>, %arg3: memref<1x128xf32, #tpu.memory_space<vmem>>, %arg4: memref<128x128xbf16, #tpu.memory_space<vmem>>, %arg5: memref<1x128xf32, #tpu.memory_space<vmem>>, %arg6: memref<128x128xbf16, #tpu.memory_space<vmem>>, %arg7: memref<1x128xf32, #tpu.memory_space<vmem>>, %arg8: memref<8x128xf32, #tpu.memory_space<vmem>>) attributes {dimension_semantics = [#tpu.dimension_semantics<parallel>], iteration_bounds = array<i64: 1>, scalar_prefetch = 0 : i64, scratch_operands = 0 : i64, tpu.core_type = #tpu.core_type<tc>, window_params = [{transform_indices = @transform_0, window_bounds = array<i64: 8, 32>}, {pipeline_mode = #tpu.pipeline_mode<synchronous>, transform_indices = @transform_1, window_bounds = array<i64: 32, 128>}, {pipeline_mode = #tpu.pipeline_mode<synchronous>, transform_indices = @transform_2, window_bounds = array<i64: 1, 128>}, {pipeline_mode = #tpu.pipeline_mode<synchronous>, transform_indices = @transform_3, window_bounds = array<i64: 128, 128>}, {pipeline_mode = #tpu.pipeline_mode<synchronous>, transform_indices = @transform_4, window_bounds = array<i64: 1, 128>}, {pipeline_mode = #tpu.pipeline_mode<synchronous>, transform_indices = @transform_5, window_bounds = array<i64: 128, 128>}, {pipeline_mode = #tpu.pipeline_mode<synchronous>, transform_indices = @transform_6, window_bounds = array<i64: 1, 128>}, {transform_indices = @transform_7, window_bounds = array<i64: 8, 128>}]} {
    %c0 = arith.constant 0 : index
    %c0_0 = arith.constant 0 : index
    %0 = vector.load %arg1[%c0, %c0_0] : memref<8x32xf32, #tpu.memory_space<vmem>>, vector<8x32xf32>
    %1 = arith.truncf %0 : vector<8x32xf32> to vector<8x32xbf16>
    %c0_1 = arith.constant 0 : index
    %c0_2 = arith.constant 0 : index
    %2 = vector.load %arg2[%c0_1, %c0_2] : memref<32x128xbf16, #tpu.memory_space<vmem>>, vector<32x128xbf16>
    %cst = arith.constant dense<0.000000e+00> : vector<8x128xf32>
    %3 = tpu.matmul %1, %2, %cst {dimension_numbers = #tpu.dot_dimension_numbers<[1], [0], [0], [1], [0, 0, 1, 1], [], []>} : vector<8x32xbf16>, vector<32x128xbf16>, vector<8x128xf32> -> vector<8x128xf32>
    %c0_3 = arith.constant 0 : index
    %c0_4 = arith.constant 0 : index
    %4 = vector.load %arg3[%c0_3, %c0_4] : memref<1x128xf32, #tpu.memory_space<vmem>>, vector<1x128xf32>
    %5 = vector.broadcast %4 : vector<1x128xf32> to vector<8x128xf32>
    %6 = arith.addf %3, %5 : vector<8x128xf32>
    %cst_5 = arith.constant 0.000000e+00 : f32
    %7 = vector.broadcast %cst_5 : f32 to vector<8x128xf32>
    %8 = arith.maximumf %6, %7 : vector<8x128xf32>
    %c0_6 = arith.constant 0 : index
    %c0_7 = arith.constant 0 : index
    %9 = vector.load %arg4[%c0_6, %c0_7] : memref<128x128xbf16, #tpu.memory_space<vmem>>, vector<128x128xbf16>
    %c0_8 = arith.constant 0 : index
    %c0_9 = arith.constant 0 : index
    %10 = vector.load %arg5[%c0_8, %c0_9] : memref<1x128xf32, #tpu.memory_space<vmem>>, vector<1x128xf32>
    %c0_i32 = arith.constant 0 : i32
    %11 = arith.truncf %8 : vector<8x128xf32> to vector<8x128xbf16>
    %cst_10 = arith.constant dense<0.000000e+00> : vector<8x128xf32>
    %12 = tpu.matmul %11, %9, %cst_10 {dimension_numbers = #tpu.dot_dimension_numbers<[1], [0], [0], [1], [0, 0, 1, 1], [], []>} : vector<8x128xbf16>, vector<128x128xbf16>, vector<8x128xf32> -> vector<8x128xf32>
    %13 = vector.broadcast %10 : vector<1x128xf32> to vector<8x128xf32>
    %14 = arith.addf %12, %13 : vector<8x128xf32>
    %cst_11 = arith.constant 0.000000e+00 : f32
    %15 = vector.broadcast %cst_11 : f32 to vector<8x128xf32>
    %16 = arith.maximumf %14, %15 : vector<8x128xf32>
    %c1_i32 = arith.constant 1 : i32
    %17 = arith.truncf %16 : vector<8x128xf32> to vector<8x128xbf16>
    %cst_12 = arith.constant dense<0.000000e+00> : vector<8x128xf32>
    %18 = tpu.matmul %17, %9, %cst_12 {dimension_numbers = #tpu.dot_dimension_numbers<[1], [0], [0], [1], [0, 0, 1, 1], [], []>} : vector<8x128xbf16>, vector<128x128xbf16>, vector<8x128xf32> -> vector<8x128xf32>
    %19 = vector.broadcast %10 : vector<1x128xf32> to vector<8x128xf32>
    %20 = arith.addf %18, %19 : vector<8x128xf32>
    %cst_13 = arith.constant 0.000000e+00 : f32
    %21 = vector.broadcast %cst_13 : f32 to vector<8x128xf32>
    %22 = arith.maximumf %20, %21 : vector<8x128xf32>
    %23 = arith.truncf %22 : vector<8x128xf32> to vector<8x128xbf16>
    %c0_14 = arith.constant 0 : index
    %c0_15 = arith.constant 0 : index
    %24 = vector.load %arg6[%c0_14, %c0_15] : memref<128x128xbf16, #tpu.memory_space<vmem>>, vector<128x128xbf16>
    %cst_16 = arith.constant dense<0.000000e+00> : vector<8x128xf32>
    %25 = tpu.matmul %23, %24, %cst_16 {dimension_numbers = #tpu.dot_dimension_numbers<[1], [0], [0], [1], [0, 0, 1, 1], [], []>} : vector<8x128xbf16>, vector<128x128xbf16>, vector<8x128xf32> -> vector<8x128xf32>
    %c0_17 = arith.constant 0 : index
    %c0_18 = arith.constant 0 : index
    %26 = vector.load %arg7[%c0_17, %c0_18] : memref<1x128xf32, #tpu.memory_space<vmem>>, vector<1x128xf32>
    %27 = vector.broadcast %26 : vector<1x128xf32> to vector<8x128xf32>
    %28 = arith.addf %25, %27 : vector<8x128xf32>
    %c0_19 = arith.constant 0 : index
    %c0_20 = arith.constant 0 : index
    %29 = vector.load %arg8[%c0_19, %c0_20] : memref<8x128xf32, #tpu.memory_space<vmem>>, vector<8x128xf32>
    tpu.vector_store %arg8[%c0_19, %c0_20], %28 {strides = array<i32>} : memref<8x128xf32, #tpu.memory_space<vmem>>, vector<8x128xf32>,
    return
  }
  func.func @transform_0(%arg0: i32) -> (i32, i32) {
    %c0_i32 = arith.constant 0 : i32
    %c0_i32_0 = arith.constant 0 : i32
    return %arg0, %c0_i32 : i32, i32
  }
  func.func @transform_1(%arg0: i32) -> (i32, i32) {
    %c0_i32 = arith.constant 0 : i32
    %c0_i32_0 = arith.constant 0 : i32
    %c0_i32_1 = arith.constant 0 : i32
    return %c0_i32, %c0_i32_0 : i32, i32
  }
  func.func @transform_2(%arg0: i32) -> (i32, i32) {
    %c0_i32 = arith.constant 0 : i32
    %c0_i32_0 = arith.constant 0 : i32
    %c0_i32_1 = arith.constant 0 : i32
    return %c0_i32, %c0_i32_0 : i32, i32
  }
  func.func @transform_3(%arg0: i32) -> (i32, i32) {
    %c0_i32 = arith.constant 0 : i32
    %c0_i32_0 = arith.constant 0 : i32
    %c0_i32_1 = arith.constant 0 : i32
    return %c0_i32, %c0_i32_0 : i32, i32
  }
  func.func @transform_4(%arg0: i32) -> (i32, i32) {
    %c0_i32 = arith.constant 0 : i32
    %c0_i32_0 = arith.constant 0 : i32
    %c0_i32_1 = arith.constant 0 : i32
    return %c0_i32, %c0_i32_0 : i32, i32
  }
  func.func @transform_5(%arg0: i32) -> (i32, i32) {
    %c0_i32 = arith.constant 0 : i32
    %c0_i32_0 = arith.constant 0 : i32
    %c0_i32_1 = arith.constant 0 : i32
    return %c0_i32, %c0_i32_0 : i32, i32
  }
  func.func @transform_6(%arg0: i32) -> (i32, i32) {
    %c0_i32 = arith.constant 0 : i32
    %c0_i32_0 = arith.constant 0 : i32
    %c0_i32_1 = arith.constant 0 : i32
    return %c0_i32, %c0_i32_0 : i32, i32
  }
  func.func @transform_7(%arg0: i32) -> (i32, i32) {
    %c0_i32 = arith.constant 0 : i32
    %c0_i32_0 = arith.constant 0 : i32
    return %arg0, %c0_i32 : i32, i32
  }
}

module attributes {stable_mosaic.version = 11 : i64} {
  func.func @mlp_kernel(%arg0: i32, %arg1: memref<8x32xf32, #tpu.memory_space<vmem>>, %arg2: memref<32x128xbf16, #tpu.memory_space<vmem>>, %arg3: memref<1x128xf32, #tpu.memory_space<vmem>>, %arg4: memref<128x128xbf16, #tpu.memory_space<vmem>>, %arg5: memref<1x128xf32, #tpu.memory_space<vmem>>, %arg6: memref<128x128xbf16, #tpu.memory_space<vmem>>, %arg7: memref<1x128xf32, #tpu.memory_space<vmem>>, %arg8: memref<8x128xf32, #tpu.memory_space<vmem>>) attributes {dimension_semantics = [#tpu.dimension_semantics<parallel>], iteration_bounds = array<i64: 1>, scalar_prefetch = 0 : i64, scratch_operands = 0 : i64, tpu.core_type = #tpu.core_type<tc>, window_params = [{transform_indices = @transform_0, window_bounds = array<i64: 8, 32>}, {pipeline_mode = #tpu.pipeline_mode<synchronous>, transform_indices = @transform_1, window_bounds = array<i64: 32, 128>}, {pipeline_mode = #tpu.pipeline_mode<synchronous>, transform_indices = @transform_2, window_bounds = array<i64: 1, 128>}, {pipeline_mode = #tpu.pipeline_mode<synchronous>, transform_indices = @transform_3, window_bounds = array<i64: 128, 128>}, {pipeline_mode = #tpu.pipeline_mode<synchronous>, transform_indices = @transform_4, window_bounds = array<i64: 1, 128>}, {pipeline_mode = #tpu.pipeline_mode<synchronous>, transform_indices = @transform_5, window_bounds = array<i64: 128, 128>}, {pipeline_mode = #tpu.pipeline_mode<synchronous>, transform_indices = @transform_6, window_bounds = array<i64: 1, 128>}, {transform_indices = @transform_7, window_bounds = array<i64: 8, 128>}]} {
    %c0 = arith.constant 0 : index
    %c0_0 = arith.constant 0 : index
    %0 = vector.load %arg1[%c0, %c0_0] : memref<8x32xf32, #tpu.memory_space<vmem>>, vector<8x32xf32>
    %1 = arith.truncf %0 : vector<8x32xf32> to vector<8x32xbf16>
    %c0_1 = arith.constant 0 : index
    %c0_2 = arith.constant 0 : index
    %2 = vector.load %arg2[%c0_1, %c0_2] : memref<32x128xbf16, #tpu.memory_space<vmem>>, vector<32x128xbf16>
    %cst = arith.constant dense<0.000000e+00> : vector<8x128xf32>
    %3 = tpu.matmul %1, %2, %cst {dimension_numbers = #tpu.dot_dimension_numbers<[1], [0], [0], [1], [0, 0, 1, 1], [], []>} : vector<8x32xbf16>, vector<32x128xbf16>, vector<8x128xf32> -> vector<8x128xf32>
    %c0_3 = arith.constant 0 : index
    %c0_4 = arith.constant 0 : index
    %4 = vector.load %arg3[%c0_3, %c0_4] : memref<1x128xf32, #tpu.memory_space<vmem>>, vector<1x128xf32>
    %5 = vector.broadcast %4 : vector<1x128xf32> to vector<8x128xf32>
    %6 = arith.addf %3, %5 : vector<8x128xf32>
    %cst_5 = arith.constant 0.000000e+00 : f32
    %7 = vector.broadcast %cst_5 : f32 to vector<8x128xf32>
    %8 = arith.maximumf %6, %7 : vector<8x128xf32>
    %c0_6 = arith.constant 0 : index
    %c0_7 = arith.constant 0 : index
    %9 = vector.load %arg4[%c0_6, %c0_7] : memref<128x128xbf16, #tpu.memory_space<vmem>>, vector<128x128xbf16>
    %c0_8 = arith.constant 0 : index
    %c0_9 = arith.constant 0 : index
    %10 = vector.load %arg5[%c0_8, %c0_9] : memref<1x128xf32, #tpu.memory_space<vmem>>, vector<1x128xf32>
    %c0_i32 = arith.constant 0 : i32
    %11 = arith.truncf %8 : vector<8x128xf32> to vector<8x128xbf16>
    %cst_10 = arith.constant dense<0.000000e+00> : vector<8x128xf32>
    %12 = tpu.matmul %11, %9, %cst_10 {dimension_numbers = #tpu.dot_dimension_numbers<[1], [0], [0], [1], [0, 0, 1, 1], [], []>} : vector<8x128xbf16>, vector<128x128xbf16>, vector<8x128xf32> -> vector<8x128xf32>
    %13 = vector.broadcast %10 : vector<1x128xf32> to vector<8x128xf32>
    %14 = arith.addf %12, %13 : vector<8x128xf32>
    %cst_11 = arith.constant 0.000000e+00 : f32
    %15 = vector.broadcast %cst_11 : f32 to vector<8x128xf32>
    %16 = arith.maximumf %14, %15 : vector<8x128xf32>
    %c1_i32 = arith.constant 1 : i32
    %17 = arith.truncf %16 : vector<8x128xf32> to vector<8x128xbf16>
    %cst_12 = arith.constant dense<0.000000e+00> : vector<8x128xf32>
    %18 = tpu.matmul %17, %9, %cst_12 {dimension_numbers = #tpu.dot_dimension_numbers<[1], [0], [0], [1], [0, 0, 1, 1], [], []>} : vector<8x128xbf16>, vector<128x128xbf16>, vector<8x128xf32> -> vector<8x128xf32>
    %19 = vector.broadcast %10 : vector<1x128xf32> to vector<8x128xf32>
    %20 = arith.addf %18, %19 : vector<8x128xf32>
    %cst_13 = arith.constant 0.000000e+00 : f32
    %21 = vector.broadcast %cst_13 : f32 to vector<8x128xf32>
    %22 = arith.maximumf %20, %21 : vector<8x128xf32>
    %23 = arith.truncf %22 : vector<8x128xf32> to vector<8x128xbf16>
    %c0_14 = arith.constant 0 : index
    %c0_15 = arith.constant 0 : index
    %24 = vector.load %arg6[%c0_14, %c0_15] : memref<128x128xbf16, #tpu.memory_space<vmem>>, vector<128x128xbf16>
    %cst_16 = arith.constant dense<0.000000e+00> : vector<8x128xf32>
    %25 = tpu.matmul %23, %24, %cst_16 {dimension_numbers = #tpu.dot_dimension_numbers<[1], [0], [0], [1], [0, 0, 1, 1], [], []>} : vector<8x128xbf16>, vector<128x128xbf16>, vector<8x128xf32> -> vector<8x128xf32>
    %c0_17 = arith.constant 0 : index
    %c0_18 = arith.constant 0 : index
    %26 = vector.load %arg7[%c0_17, %c0_18] : memref<1x128xf32, #tpu.memory_space<vmem>>, vector<1x128xf32>
    %27 = vector.broadcast %26 : vector<1x128xf32> to vector<8x128xf32>
    %28 = arith.addf %25, %27 : vector<8x128xf32>
    %c0_19 = arith.constant 0 : index
    %c0_20 = arith.constant 0 : index
    %29 = vector.load %arg8[%c0_19, %c0_20] : memref<8x128xf32, #tpu.memory_space<vmem>>, vector<8x128xf32>
    tpu.vector_store %arg8[%c0_19, %c0_20], %28 {strides = array<i32>} : memref<8x128xf32, #tpu.memory_space<vmem>>, vector<8x128xf32>,
    return
  }
  func.func @transform_0(%arg0: i32) -> (i32, i32) {
    %c0_i32 = arith.constant 0 : i32
    %c0_i32_0 = arith.constant 0 : i32
    return %arg0, %c0_i32 : i32, i32
  }
  func.func @transform_1(%arg0: i32) -> (i32, i32) {
    %c0_i32 = arith.constant 0 : i32
    %c0_i32_0 = arith.constant 0 : i32
    %c0_i32_1 = arith.constant 0 : i32
    return %c0_i32, %c0_i32_0 : i32, i32
  }
  func.func @transform_2(%arg0: i32) -> (i32, i32) {
    %c0_i32 = arith.constant 0 : i32
    %c0_i32_0 = arith.constant 0 : i32
    %c0_i32_1 = arith.constant 0 : i32
    return %c0_i32, %c0_i32_0 : i32, i32
  }
  func.func @transform_3(%arg0: i32) -> (i32, i32) {
    %c0_i32 = arith.constant 0 : i32
    %c0_i32_0 = arith.constant 0 : i32
    %c0_i32_1 = arith.constant 0 : i32
    return %c0_i32, %c0_i32_0 : i32, i32
  }
  func.func @transform_4(%arg0: i32) -> (i32, i32) {
    %c0_i32 = arith.constant 0 : i32
    %c0_i32_0 = arith.constant 0 : i32
    %c0_i32_1 = arith.constant 0 : i32
    return %c0_i32, %c0_i32_0 : i32, i32
  }
  func.func @transform_5(%arg0: i32) -> (i32, i32) {
    %c0_i32 = arith.constant 0 : i32
    %c0_i32_0 = arith.constant 0 : i32
    %c0_i32_1 = arith.constant 0 : i32
    return %c0_i32, %c0_i32_0 : i32, i32
  }
  func.func @transform_6(%arg0: i32) -> (i32, i32) {
    %c0_i32 = arith.constant 0 : i32
    %c0_i32_0 = arith.constant 0 : i32
    %c0_i32_1 = arith.constant 0 : i32
    return %c0_i32, %c0_i32_0 : i32, i32
  }
  func.func @transform_7(%arg0: i32) -> (i32, i32) {
    %c0_i32 = arith.constant 0 : i32
    %c0_i32_0 = arith.constant 0 : i32
    return %arg0, %c0_i32 : i32, i32
  }
}

</mosaic_0001>

<bundles_post_ra>
// kernel: tpu_custom_call.1
= control target key start
LH: loop header
LB: loop body
LE: loop exit
PB: predicated region body
PF: predicated region fallthrough
CT: control target
= control target key end

     0   :  { %12 = vsyncpa [#allocation3], 0  ;;  %s807_s0 = inlined_call_operand.hbm [shape: f32[8,32], index: 0, kind: input, shape index: {}]   ;;  %s808_s1 = inlined_call_operand.hbm [shape: bf16[32,128], index: 1, kind: input, shape index: {}]   ;;  %s809_s2 = inlined_call_operand.vmem [shape: f32[1,128], index: 2, kind: input, shape index: {}]   ;;  %s810_s3 = inlined_call_operand.hbm [shape: bf16[128,128], index: 3, kind: input, shape index: {}]   ;;  %s811_s4 = inlined_call_operand.vmem [shape: f32[1,128], index: 4, kind: input, shape index: {}]   ;;  %s812_s5 = inlined_call_operand.hbm [shape: bf16[128,128], index: 5, kind: input, shape index: {}]   ;;  %s813_s6 = inlined_call_operand.vmem [shape: f32[1,128], index: 6, kind: input, shape index: {}]   ;;  %s814_s7 = inlined_call_operand.hbm [shape: f32[8,128], index: 7, kind: output, shape index: {}]  }
   0x1   :  { %13 = vsyncpa [#allocation6], 0 }
   0x2   :  { %14 = vsyncpa [#allocation9], 0 }
   0x3   :  { %15 = vsyncpa [#allocation4], 0  ;;  %s691_s24 = smov [#allocation5]  }
   0x4   :  { %s31_s25 = sshll.u32 %s691_s24, 4  ;;  %s32_s25 = int_to_ptr.vmem [resolvable:$true] %s31_s25 }
   0x5   :  { %s591_s26 = scalar_lea.vmem %s32_s25, 256  ;;  %p596_p1 = scmp.lt.s32.totalorder %s32_s25, %s32_s25 }
   0x6   :  { %p592_p0 = scmp.ne.s32.totalorder %s32_s25, %s591_s26  ;;  %p597_p2 = scmp.lt.s32.totalorder %s591_s26, %s591_s26 }
   0x8   :  { %p598_p3 = por %p597_p2, %p596_p1 }
   0xa   :  { %p599_p4 = pnand %p598_p3, %p592_p0 }
   0xc   :  { %602 = shalt.err (!%p599_p4)
}
   0xd   :  { %s692_s27 = smov 64   ;;  %s693_s28 = smov 4  }
   0xe   :  { %37 = dma.hbm_to_vmem [thread:$0]  %s808_s1, 256, %s32_s25, [#allocation6], %s692_s27, %s692_s27, %s693_s28  }
   0xf   :  { %s694_s8 = smov [#allocation2]   ;;  %s695_s10 = smov [#allocation7]  }
  0x10   :  { %s22_s9 = sshll.u32 %s694_s8, 4  ;;  %s45_s11 = sshll.u32 %s695_s10, 4  ;;  %s23_s9 = int_to_ptr.vmem [resolvable:$true] %s22_s9  ;;  %s46_s11 = int_to_ptr.vmem [resolvable:$true] %s45_s11 }
  0x11   :  { %s611_s12 = scalar_lea.vmem %s23_s9, 128  ;;  %p616_p6 = scmp.lt.s32.totalorder %s23_s9, %s23_s9 }
  0x12   :  { %p612_p5 = scmp.ne.s32.totalorder %s23_s9, %s611_s12  ;;  %p617_p7 = scmp.lt.s32.totalorder %s611_s12, %s611_s12 }
  0x14   :  { %p618_p8 = por %p617_p7, %p616_p6 }
  0x16   :  { %p619_p9 = pnand %p618_p8, %p612_p5 }
  0x18   :  { %622 = shalt.err (!%p619_p9)
}
  0x19   :  { %25 = dma.hbm_to_vmem [thread:$0]  %s807_s0, 128, %s23_s9, [#allocation3]  }
  0x1a   :  { %s631_s15 = scalar_lea.vmem %s46_s11, 1024  ;;  %p636_p11 = scmp.lt.s32.totalorder %s46_s11, %s46_s11 }
  0x1b   :  { %p632_p10 = scmp.ne.s32.totalorder %s46_s11, %s631_s15  ;;  %p637_p12 = scmp.lt.s32.totalorder %s631_s15, %s631_s15 }
  0x1d   :  { %p638_p13 = por %p637_p12, %p636_p11 }
  0x1f   :  { %p639_p0 = pnand %p638_p13, %p632_p10 }
  0x21   :  { %642 = shalt.err (!%p639_p0)
}
  0x22   :  { %51 = dma.hbm_to_vmem [thread:$0]  %s810_s3, 1024, %s46_s11, [#allocation6], %s692_s27, %s692_s27, %s693_s28  }
  0x23   :  { %s696_s17 = smov [#allocation8]  }
  0x24   :  { %s59_s18 = sshll.u32 %s696_s17, 4  ;;  %s60_s18 = int_to_ptr.vmem [resolvable:$true] %s59_s18 }
  0x25   :  { %s651_s19 = scalar_lea.vmem %s60_s18, 1024  ;;  %p656_p2 = scmp.lt.s32.totalorder %s60_s18, %s60_s18 }
  0x26   :  { %p652_p1 = scmp.ne.s32.totalorder %s60_s18, %s651_s19  ;;  %p657_p3 = scmp.lt.s32.totalorder %s651_s19, %s651_s19 }
  0x28   :  { %p658_p4 = por %p657_p3, %p656_p2 }
  0x2a   :  { %p659_p5 = pnand %p658_p4, %p652_p1 }
  0x2c   :  { %662 = shalt.err (!%p659_p5)
}
  0x2d   :  { %65 = dma.hbm_to_vmem [thread:$0]  %s812_s5, 1024, %s60_s18, [#allocation9], %s692_s27, %s692_s27, %s693_s28  }
  0x2e   :  { %683 = dma.done.wait [#allocation3], 128  }
  0x2f   :  { %684 = vsyncadd [#allocation3], 4294967168 }
  0x30   :  { %685 = dma.done.wait [#allocation6], 1280  }
  0x31   :  { %686 = vsyncadd [#allocation6], 4294966016 }
  0x32   :  { %687 = dma.done.wait [#allocation9], 1024  }
  0x33   :  { %688 = vsyncadd [#allocation9], 4294966272  ;;  %v697_v0 = vmov 0.0   ;;  %vm698_vm0 = vmmov 0   ;;  %v565_v1 = vld [vmem:[#allocation5 + $0x8] sm:$0xff]   ;;  %v566_v2 = vld [vmem:[#allocation5] sm:$0xff]  }
  0x34   :  { %488 = vmatprep.subr.bf16.mxu0 %v697_v0  ;;  %492 = vmatprep.mubr.msk.bf16.mxu0 %vm698_vm0, %v697_v0  ;;  %v81_v3 = vld [vmem:[#allocation2] sm:$0xff]  ;;  %v567_v4 = vld [vmem:[#allocation7 + $0x38] sm:$0xff]   ;;  %v568_v6 = vld [vmem:[#allocation7 + $0x30] sm:$0xff]   ;;  %vm106_vm1 = vcmask 261120   ;;  %s699_s23 = smov [#allocation10]  }
  0x35   :  { %496 = vmatprep.subr.bf16.mxu1 %v697_v0  ;;  %512 = vmatprep.mubr.msk.bf16.mxu1 %vm698_vm0, %v697_v0  ;;  %v82_v5 = vpack.c.bf16 %v81_v3, %v81_v3  ;;  %v569_v7 = vld [vmem:[#allocation7 + $0x28] sm:$0xff]   ;;  %v570_v8 = vld [vmem:[#allocation7 + $0x20] sm:$0xff]   ;;  %v571_v9 = vld [vmem:[#allocation7 + $0x18] sm:$0xff]   ;;  %s425_s24 = sshll.u32 %s699_s23, 4  ;;  %s426_s24 = int_to_ptr.vmem [resolvable:$true] %s425_s24 }
  0x36   :  { %489 = vmatpush3.bf16.msra.mxu0 %v565_v1  ;;  %497 = vmatpush3.bf16.msra.mxu1 %v567_v4  ;;  %v572_v10 = vld [vmem:[#allocation7 + $0x10] sm:$0xff]   ;;  %v573_v11 = vld [vmem:[#allocation7 + $0x8] sm:$0xff]   ;;  %v574_v12 = vld [vmem:[#allocation7] sm:$0xff]   ;;  %s663_s25 = scalar_lea.vmem %s426_s24, 128  ;;  %p668_p7 = scmp.lt.s32.totalorder %s426_s24, %s426_s24 }
  0x37   :  { %490 = vmatprep.subr.bf16.mxu0 %v697_v0  ;;  %498 = vmatprep.subr.bf16.mxu1 %v697_v0  ;;  %v436_v13 = vld [vmem:[%s809_s2] ss:$0 sm:$0xff]  ;;  %v575_v21 = vld [vmem:[#allocation8 + $0x38] sm:$0xff]   ;;  %v576_v22 = vld [vmem:[#allocation8 + $0x30] sm:$0xff]   ;;  %p664_p6 = scmp.ne.s32.totalorder %s426_s24, %s663_s25  ;;  %p669_p8 = scmp.lt.s32.totalorder %s663_s25, %s663_s25 }
  0x38   :  { %v577_v23 = vld [vmem:[#allocation8 + $0x28] sm:$0xff]   ;;  %v578_v24 = vld [vmem:[#allocation8 + $0x20] sm:$0xff]   ;;  %v579_v25 = vld [vmem:[#allocation8 + $0x18] sm:$0xff]  }
  0x39   :  { %v580_v26 = vld [vmem:[#allocation8 + $0x10] sm:$0xff]   ;;  %v440_v27 = vld [vmem:[%s811_s4] ss:$0 sm:$0xff]  ;;  %v582_v36 = vld [vmem:[#allocation8] sm:$0xff]   ;;  %p670_p9 = por %p669_p8, %p668_p7 }
  0x3a   :  { %491 = vmatpush3.bf16.msra.mxu0 %v566_v2  ;;  %499 = vmatpush3.bf16.msra.mxu1 %v568_v6  ;;  %v581_v35 = vld [vmem:[#allocation8 + $0x8] sm:$0xff]  }
  0x3b   :  { %516 = vmatprep.subr.bf16.mxu0 %v697_v0  ;;  %500 = vmatprep.subr.bf16.mxu1 %v697_v0  ;;  %v449_v44 = vld [vmem:[%s813_s6] ss:$0 sm:$0xff]  ;;  %p671_p10 = pnand %p670_p9, %p664_p6 }
  0x3d   :  { %493 = vmatmul.mubr.msk.bf16.vlgmr.msra.gmra.mxu0 %vm106_vm1, %v82_v5 }
  0x3e   :  { %517 = vmatpush3.bf16.msra.mxu0 %v567_v4  ;;  %532 = vmatprep.mubr.msk.bf16.mxu0 %vm698_vm0, %v697_v0 }
  0x3f   :  { %518 = vmatprep.subr.bf16.mxu0 %v697_v0  ;;  %501 = vmatpush3.bf16.msra.mxu1 %v569_v7 }
  0x40   :  { %502 = vmatprep.subr.bf16.mxu1 %v697_v0 }
  0x42   :  { %519 = vmatpush3.bf16.msra.mxu0 %v568_v6 }
  0x43   :  { %520 = vmatprep.subr.bf16.mxu0 %v697_v0  ;;  %503 = vmatpush3.bf16.msra.mxu1 %v570_v8 }
  0x44   :  { %504 = vmatprep.subr.bf16.mxu1 %v697_v0 }
  0x46   :  { %521 = vmatpush3.bf16.msra.mxu0 %v569_v7 }
  0x47   :  { %522 = vmatprep.subr.bf16.mxu0 %v697_v0  ;;  %505 = vmatpush3.bf16.msra.mxu1 %v571_v9 }
  0x48   :  { %506 = vmatprep.subr.bf16.mxu1 %v697_v0 }
  0x4a   :  { %523 = vmatpush3.bf16.msra.mxu0 %v570_v8 }
  0x4b   :  { %524 = vmatprep.subr.bf16.mxu0 %v697_v0  ;;  %507 = vmatpush3.bf16.msra.mxu1 %v572_v10 }
  0x4c   :  { %508 = vmatprep.subr.bf16.mxu1 %v697_v0 }
  0x4e   :  { %525 = vmatpush3.bf16.msra.mxu0 %v571_v9 }
  0x4f   :  { %526 = vmatprep.subr.bf16.mxu0 %v697_v0  ;;  %509 = vmatpush3.bf16.msra.mxu1 %v573_v11 }
  0x50   :  { %510 = vmatprep.subr.bf16.mxu1 %v697_v0 }
  0x52   :  { %527 = vmatpush3.bf16.msra.mxu0 %v572_v10 }
  0x53   :  { %528 = vmatprep.subr.bf16.mxu0 %v697_v0  ;;  %511 = vmatpush3.bf16.msra.mxu1 %v574_v12 }
  0x54   :  { %536 = vmatprep.subr.bf16.mxu1 %v697_v0 }
  0x56   :  { %529 = vmatpush3.bf16.msra.mxu0 %v573_v11 }
  0x57   :  { %530 = vmatprep.subr.bf16.mxu0 %v697_v0 }
  0x5a   :  { %531 = vmatpush3.bf16.msra.mxu0 %v574_v12 }
  0xfd   :  { %v144_v14 = vpop.f32.mrf.mxu0 }
  0xfe   :  { %v145_v15 = vadd.f32 %v436_v13, %v144_v14 }
  0xff   :  { %v494_v16 = vpop.f32.mrf.mxu0 }
 0x100   :  { %v150_v17 = vmax.f32 %v145_v15, 0.0 }
 0x101   :  { %v147_v18 = vpop.f32.mrf.mxu0 }
 0x102   :  { %v168_v19 = vpack.c.bf16 %v150_v17, %v150_v17 }
 0x103   :  { %v495_v20 = vpop.f32.mrf.mxu0 }
 0x104   :  { %513 = vmatmul.mubr.bf16.vlgmr.msra.gmra.mxu1 %v168_v19 }
 0x105   :  { %552 = vmatprep.mubr.msk.bf16.mxu1 %vm698_vm0, %v697_v0  ;;  %537 = vmatpush3.bf16.msra.mxu1 %v575_v21 }
 0x106   :  { %538 = vmatprep.subr.bf16.mxu1 %v697_v0 }
 0x109   :  { %539 = vmatpush3.bf16.msra.mxu1 %v576_v22 }
 0x10a   :  { %540 = vmatprep.subr.bf16.mxu1 %v697_v0 }
 0x10d   :  { %541 = vmatpush3.bf16.msra.mxu1 %v577_v23 }
 0x10e   :  { %542 = vmatprep.subr.bf16.mxu1 %v697_v0 }
 0x111   :  { %543 = vmatpush3.bf16.msra.mxu1 %v578_v24 }
 0x112   :  { %544 = vmatprep.subr.bf16.mxu1 %v697_v0 }
 0x115   :  { %545 = vmatpush3.bf16.msra.mxu1 %v579_v25 }
 0x116   :  { %546 = vmatprep.subr.bf16.mxu1 %v697_v0 }
 0x119   :  { %547 = vmatpush3.bf16.msra.mxu1 %v580_v26 }
 0x11a   :  { %548 = vmatprep.subr.bf16.mxu1 %v697_v0 }
 0x11d   :  { %549 = vmatpush3.bf16.msra.mxu1 %v581_v35 }
 0x11e   :  { %550 = vmatprep.subr.bf16.mxu1 %v697_v0 }
 0x121   :  { %551 = vmatpush3.bf16.msra.mxu1 %v582_v36 }
 0x1c4   :  { %v257_v28 = vpop.f32.mrf.mxu1 }
 0x1c5   :  { %v258_v29 = vadd.f32 %v440_v27, %v257_v28 }
 0x1c6   :  { %v514_v30 = vpop.f32.mrf.mxu1 }
 0x1c7   :  { %v263_v31 = vmax.f32 %v258_v29, 0.0 }
 0x1c8   :  { %v260_v32 = vpop.f32.mrf.mxu1 }
 0x1c9   :  { %v264_v33 = vpack.c.bf16 %v263_v31, %v263_v31 }
 0x1ca   :  { %v515_v34 = vpop.f32.mrf.mxu1 }
 0x1cb   :  { %533 = vmatmul.mubr.bf16.vlgmr.msra.gmra.mxu0 %v264_v33 }
 0x28b   :  { %v299_v37 = vpop.f32.mrf.mxu0 }
 0x28c   :  { %v300_v38 = vadd.f32 %v440_v27, %v299_v37 }
 0x28d   :  { %v534_v39 = vpop.f32.mrf.mxu0 }
 0x28e   :  { %v305_v40 = vmax.f32 %v300_v38, 0.0 }
 0x28f   :  { %v302_v41 = vpop.f32.mrf.mxu0 }
 0x290   :  { %v306_v42 = vpack.c.bf16 %v305_v40, %v305_v40 }
 0x291   :  { %v535_v43 = vpop.f32.mrf.mxu0 }
 0x292   :  { %553 = vmatmul.mubr.bf16.vlgmr.msra.gmra.mxu1 %v306_v42 }
 0x352   :  { %v412_v45 = vpop.f32.mrf.mxu1 }
 0x353   :  { %v413_v46 = vadd.f32 %v449_v44, %v412_v45 }
 0x354   :  { %v554_v47 = vpop.f32.mrf.mxu1 }
 0x355   :  { %418 = vst [vmem:[#allocation10] sm:$0xff] %v413_v46 }
 0x356   :  { %v415_v48 = vpop.f32.mrf.mxu1 }
 0x357   :  { %674 = shalt.err (!%p671_p10)
}
 0x358   :  { %428 = dma.vmem_to_hbm [thread:$0]  %s426_s24, 128, %s814_s7, [#allocation4]   ;;  %v555_v49 = vpop.f32.mrf.mxu1 }
 0x359   :  { %689 = dma.done.wait [#allocation4], 128  }
 0x35a   :  { %690 = vsyncadd [#allocation4], 4294967168 }
 0x35b   :  { %432 = vsyncpa [#allocation3], 1 }
 0x35c   :  { %433 = vsyncpa [#allocation6], 1 }
 0x35d   :  { %434 = vsyncpa [#allocation9], 1 }
 0x35e   :  { %435 = vsyncpa [#allocation4], 1 }

// kernel: tpu_custom_call.1
= control target key start
LH: loop header
LB: loop body
LE: loop exit
PB: predicated region body
PF: predicated region fallthrough
CT: control target
= control target key end

     0   :  { %12 = vsyncpa [#allocation3], 0  ;;  %s807_s0 = inlined_call_operand.hbm [shape: f32[8,32], index: 0, kind: input, shape index: {}]   ;;  %s808_s1 = inlined_call_operand.hbm [shape: bf16[32,128], index: 1, kind: input, shape index: {}]   ;;  %s809_s2 = inlined_call_operand.vmem [shape: f32[1,128], index: 2, kind: input, shape index: {}]   ;;  %s810_s3 = inlined_call_operand.hbm [shape: bf16[128,128], index: 3, kind: input, shape index: {}]   ;;  %s811_s4 = inlined_call_operand.vmem [shape: f32[1,128], index: 4, kind: input, shape index: {}]   ;;  %s812_s5 = inlined_call_operand.hbm [shape: bf16[128,128], index: 5, kind: input, shape index: {}]   ;;  %s813_s6 = inlined_call_operand.vmem [shape: f32[1,128], index: 6, kind: input, shape index: {}]   ;;  %s814_s7 = inlined_call_operand.hbm [shape: f32[8,128], index: 7, kind: output, shape index: {}]  }
   0x1   :  { %13 = vsyncpa [#allocation6], 0 }
   0x2   :  { %14 = vsyncpa [#allocation9], 0 }
   0x3   :  { %15 = vsyncpa [#allocation4], 0  ;;  %s691_s24 = smov [#allocation5]  }
   0x4   :  { %s31_s25 = sshll.u32 %s691_s24, 4  ;;  %s32_s25 = int_to_ptr.vmem [resolvable:$true] %s31_s25 }
   0x5   :  { %s591_s26 = scalar_lea.vmem %s32_s25, 256  ;;  %p596_p1 = scmp.lt.s32.totalorder %s32_s25, %s32_s25 }
   0x6   :  { %p592_p0 = scmp.ne.s32.totalorder %s32_s25, %s591_s26  ;;  %p597_p2 = scmp.lt.s32.totalorder %s591_s26, %s591_s26 }
   0x8   :  { %p598_p3 = por %p597_p2, %p596_p1 }
   0xa   :  { %p599_p4 = pnand %p598_p3, %p592_p0 }
   0xc   :  { %602 = shalt.err (!%p599_p4)
}
   0xd   :  { %s692_s27 = smov 64   ;;  %s693_s28 = smov 4  }
   0xe   :  { %37 = dma.hbm_to_vmem [thread:$0]  %s808_s1, 256, %s32_s25, [#allocation6], %s692_s27, %s692_s27, %s693_s28  }
   0xf   :  { %s694_s8 = smov [#allocation2]   ;;  %s695_s10 = smov [#allocation7]  }
  0x10   :  { %s22_s9 = sshll.u32 %s694_s8, 4  ;;  %s45_s11 = sshll.u32 %s695_s10, 4  ;;  %s23_s9 = int_to_ptr.vmem [resolvable:$true] %s22_s9  ;;  %s46_s11 = int_to_ptr.vmem [resolvable:$true] %s45_s11 }
  0x11   :  { %s611_s12 = scalar_lea.vmem %s23_s9, 128  ;;  %p616_p6 = scmp.lt.s32.totalorder %s23_s9, %s23_s9 }
  0x12   :  { %p612_p5 = scmp.ne.s32.totalorder %s23_s9, %s611_s12  ;;  %p617_p7 = scmp.lt.s32.totalorder %s611_s12, %s611_s12 }
  0x14   :  { %p618_p8 = por %p617_p7, %p616_p6 }
  0x16   :  { %p619_p9 = pnand %p618_p8, %p612_p5 }
  0x18   :  { %622 = shalt.err (!%p619_p9)
}
  0x19   :  { %25 = dma.hbm_to_vmem [thread:$0]  %s807_s0, 128, %s23_s9, [#allocation3]  }
  0x1a   :  { %s631_s15 = scalar_lea.vmem %s46_s11, 1024  ;;  %p636_p11 = scmp.lt.s32.totalorder %s46_s11, %s46_s11 }
  0x1b   :  { %p632_p10 = scmp.ne.s32.totalorder %s46_s11, %s631_s15  ;;  %p637_p12 = scmp.lt.s32.totalorder %s631_s15, %s631_s15 }
  0x1d   :  { %p638_p13 = por %p637_p12, %p636_p11 }
  0x1f   :  { %p639_p0 = pnand %p638_p13, %p632_p10 }
  0x21   :  { %642 = shalt.err (!%p639_p0)
}
  0x22   :  { %51 = dma.hbm_to_vmem [thread:$0]  %s810_s3, 1024, %s46_s11, [#allocation6], %s692_s27, %s692_s27, %s693_s28  }
  0x23   :  { %s696_s17 = smov [#allocation8]  }
  0x24   :  { %s59_s18 = sshll.u32 %s696_s17, 4  ;;  %s60_s18 = int_to_ptr.vmem [resolvable:$true] %s59_s18 }
  0x25   :  { %s651_s19 = scalar_lea.vmem %s60_s18, 1024  ;;  %p656_p2 = scmp.lt.s32.totalorder %s60_s18, %s60_s18 }
  0x26   :  { %p652_p1 = scmp.ne.s32.totalorder %s60_s18, %s651_s19  ;;  %p657_p3 = scmp.lt.s32.totalorder %s651_s19, %s651_s19 }
  0x28   :  { %p658_p4 = por %p657_p3, %p656_p2 }
  0x2a   :  { %p659_p5 = pnand %p658_p4, %p652_p1 }
  0x2c   :  { %662 = shalt.err (!%p659_p5)
}
  0x2d   :  { %65 = dma.hbm_to_vmem [thread:$0]  %s812_s5, 1024, %s60_s18, [#allocation9], %s692_s27, %s692_s27, %s693_s28  }
  0x2e   :  { %683 = dma.done.wait [#allocation3], 128  }
  0x2f   :  { %684 = vsyncadd [#allocation3], 4294967168 }
  0x30   :  { %685 = dma.done.wait [#allocation6], 1280  }
  0x31   :  { %686 = vsyncadd [#allocation6], 4294966016 }
  0x32   :  { %687 = dma.done.wait [#allocation9], 1024  }
  0x33   :  { %688 = vsyncadd [#allocation9], 4294966272  ;;  %v697_v0 = vmov 0.0   ;;  %vm698_vm0 = vmmov 0   ;;  %v565_v1 = vld [vmem:[#allocation5 + $0x8] sm:$0xff]   ;;  %v566_v2 = vld [vmem:[#allocation5] sm:$0xff]  }
  0x34   :  { %488 = vmatprep.subr.bf16.mxu0 %v697_v0  ;;  %492 = vmatprep.mubr.msk.bf16.mxu0 %vm698_vm0, %v697_v0  ;;  %v81_v3 = vld [vmem:[#allocation2] sm:$0xff]  ;;  %v567_v4 = vld [vmem:[#allocation7 + $0x38] sm:$0xff]   ;;  %v568_v6 = vld [vmem:[#allocation7 + $0x30] sm:$0xff]   ;;  %vm106_vm1 = vcmask 261120   ;;  %s699_s23 = smov [#allocation10]  }
  0x35   :  { %496 = vmatprep.subr.bf16.mxu1 %v697_v0  ;;  %512 = vmatprep.mubr.msk.bf16.mxu1 %vm698_vm0, %v697_v0  ;;  %v82_v5 = vpack.c.bf16 %v81_v3, %v81_v3  ;;  %v569_v7 = vld [vmem:[#allocation7 + $0x28] sm:$0xff]   ;;  %v570_v8 = vld [vmem:[#allocation7 + $0x20] sm:$0xff]   ;;  %v571_v9 = vld [vmem:[#allocation7 + $0x18] sm:$0xff]   ;;  %s425_s24 = sshll.u32 %s699_s23, 4  ;;  %s426_s24 = int_to_ptr.vmem [resolvable:$true] %s425_s24 }
  0x36   :  { %489 = vmatpush3.bf16.msra.mxu0 %v565_v1  ;;  %497 = vmatpush3.bf16.msra.mxu1 %v567_v4  ;;  %v572_v10 = vld [vmem:[#allocation7 + $0x10] sm:$0xff]   ;;  %v573_v11 = vld [vmem:[#allocation7 + $0x8] sm:$0xff]   ;;  %v574_v12 = vld [vmem:[#allocation7] sm:$0xff]   ;;  %s663_s25 = scalar_lea.vmem %s426_s24, 128  ;;  %p668_p7 = scmp.lt.s32.totalorder %s426_s24, %s426_s24 }
  0x37   :  { %490 = vmatprep.subr.bf16.mxu0 %v697_v0  ;;  %498 = vmatprep.subr.bf16.mxu1 %v697_v0  ;;  %v436_v13 = vld [vmem:[%s809_s2] ss:$0 sm:$0xff]  ;;  %v575_v21 = vld [vmem:[#allocation8 + $0x38] sm:$0xff]   ;;  %v576_v22 = vld [vmem:[#allocation8 + $0x30] sm:$0xff]   ;;  %p664_p6 = scmp.ne.s32.totalorder %s426_s24, %s663_s25  ;;  %p669_p8 = scmp.lt.s32.totalorder %s663_s25, %s663_s25 }
  0x38   :  { %v577_v23 = vld [vmem:[#allocation8 + $0x28] sm:$0xff]   ;;  %v578_v24 = vld [vmem:[#allocation8 + $0x20] sm:$0xff]   ;;  %v579_v25 = vld [vmem:[#allocation8 + $0x18] sm:$0xff]  }
  0x39   :  { %v580_v26 = vld [vmem:[#allocation8 + $0x10] sm:$0xff]   ;;  %v440_v27 = vld [vmem:[%s811_s4] ss:$0 sm:$0xff]  ;;  %v582_v36 = vld [vmem:[#allocation8] sm:$0xff]   ;;  %p670_p9 = por %p669_p8, %p668_p7 }
  0x3a   :  { %491 = vmatpush3.bf16.msra.mxu0 %v566_v2  ;;  %499 = vmatpush3.bf16.msra.mxu1 %v568_v6  ;;  %v581_v35 = vld [vmem:[#allocation8 + $0x8] sm:$0xff]  }
  0x3b   :  { %516 = vmatprep.subr.bf16.mxu0 %v697_v0  ;;  %500 = vmatprep.subr.bf16.mxu1 %v697_v0  ;;  %v449_v44 = vld [vmem:[%s813_s6] ss:$0 sm:$0xff]  ;;  %p671_p10 = pnand %p670_p9, %p664_p6 }
  0x3d   :  { %493 = vmatmul.mubr.msk.bf16.vlgmr.msra.gmra.mxu0 %vm106_vm1, %v82_v5 }
  0x3e   :  { %517 = vmatpush3.bf16.msra.mxu0 %v567_v4  ;;  %532 = vmatprep.mubr.msk.bf16.mxu0 %vm698_vm0, %v697_v0 }
  0x3f   :  { %518 = vmatprep.subr.bf16.mxu0 %v697_v0  ;;  %501 = vmatpush3.bf16.msra.mxu1 %v569_v7 }
  0x40   :  { %502 = vmatprep.subr.bf16.mxu1 %v697_v0 }
  0x42   :  { %519 = vmatpush3.bf16.msra.mxu0 %v568_v6 }
  0x43   :  { %520 = vmatprep.subr.bf16.mxu0 %v697_v0  ;;  %503 = vmatpush3.bf16.msra.mxu1 %v570_v8 }
  0x44   :  { %504 = vmatprep.subr.bf16.mxu1 %v697_v0 }
  0x46   :  { %521 = vmatpush3.bf16.msra.mxu0 %v569_v7 }
  0x47   :  { %522 = vmatprep.subr.bf16.mxu0 %v697_v0  ;;  %505 = vmatpush3.bf16.msra.mxu1 %v571_v9 }
  0x48   :  { %506 = vmatprep.subr.bf16.mxu1 %v697_v0 }
  0x4a   :  { %523 = vmatpush3.bf16.msra.mxu0 %v570_v8 }
  0x4b   :  { %524 = vmatprep.subr.bf16.mxu0 %v697_v0  ;;  %507 = vmatpush3.bf16.msra.mxu1 %v572_v10 }
  0x4c   :  { %508 = vmatprep.subr.bf16.mxu1 %v697_v0 }
  0x4e   :  { %525 = vmatpush3.bf16.msra.mxu0 %v571_v9 }
  0x4f   :  { %526 = vmatprep.subr.bf16.mxu0 %v697_v0  ;;  %509 = vmatpush3.bf16.msra.mxu1 %v573_v11 }
  0x50   :  { %510 = vmatprep.subr.bf16.mxu1 %v697_v0 }
  0x52   :  { %527 = vmatpush3.bf16.msra.mxu0 %v572_v10 }
  0x53   :  { %528 = vmatprep.subr.bf16.mxu0 %v697_v0  ;;  %511 = vmatpush3.bf16.msra.mxu1 %v574_v12 }
  0x54   :  { %536 = vmatprep.subr.bf16.mxu1 %v697_v0 }
  0x56   :  { %529 = vmatpush3.bf16.msra.mxu0 %v573_v11 }
  0x57   :  { %530 = vmatprep.subr.bf16.mxu0 %v697_v0 }
  0x5a   :  { %531 = vmatpush3.bf16.msra.mxu0 %v574_v12 }
  0xfd   :  { %v144_v14 = vpop.f32.mrf.mxu0 }
  0xfe   :  { %v145_v15 = vadd.f32 %v436_v13, %v144_v14 }
  0xff   :  { %v494_v16 = vpop.f32.mrf.mxu0 }
 0x100   :  { %v150_v17 = vmax.f32 %v145_v15, 0.0 }
 0x101   :  { %v147_v18 = vpop.f32.mrf.mxu0 }
 0x102   :  { %v168_v19 = vpack.c.bf16 %v150_v17, %v150_v17 }
 0x103   :  { %v495_v20 = vpop.f32.mrf.mxu0 }
 0x104   :  { %513 = vmatmul.mubr.bf16.vlgmr.msra.gmra.mxu1 %v168_v19 }
 0x105   :  { %552 = vmatprep.mubr.msk.bf16.mxu1 %vm698_vm0, %v697_v0  ;;  %537 = vmatpush3.bf16.msra.mxu1 %v575_v21 }
 0x106   :  { %538 = vmatprep.subr.bf16.mxu1 %v697_v0 }
 0x109   :  { %539 = vmatpush3.bf16.msra.mxu1 %v576_v22 }
 0x10a   :  { %540 = vmatprep.subr.bf16.mxu1 %v697_v0 }
 0x10d   :  { %541 = vmatpush3.bf16.msra.mxu1 %v577_v23 }
 0x10e   :  { %542 = vmatprep.subr.bf16.mxu1 %v697_v0 }
 0x111   :  { %543 = vmatpush3.bf16.msra.mxu1 %v578_v24 }
 0x112   :  { %544 = vmatprep.subr.bf16.mxu1 %v697_v0 }
 0x115   :  { %545 = vmatpush3.bf16.msra.mxu1 %v579_v25 }
 0x116   :  { %546 = vmatprep.subr.bf16.mxu1 %v697_v0 }
 0x119   :  { %547 = vmatpush3.bf16.msra.mxu1 %v580_v26 }
 0x11a   :  { %548 = vmatprep.subr.bf16.mxu1 %v697_v0 }
 0x11d   :  { %549 = vmatpush3.bf16.msra.mxu1 %v581_v35 }
 0x11e   :  { %550 = vmatprep.subr.bf16.mxu1 %v697_v0 }
 0x121   :  { %551 = vmatpush3.bf16.msra.mxu1 %v582_v36 }
 0x1c4   :  { %v257_v28 = vpop.f32.mrf.mxu1 }
 0x1c5   :  { %v258_v29 = vadd.f32 %v440_v27, %v257_v28 }
 0x1c6   :  { %v514_v30 = vpop.f32.mrf.mxu1 }
 0x1c7   :  { %v263_v31 = vmax.f32 %v258_v29, 0.0 }
 0x1c8   :  { %v260_v32 = vpop.f32.mrf.mxu1 }
 0x1c9   :  { %v264_v33 = vpack.c.bf16 %v263_v31, %v263_v31 }
 0x1ca   :  { %v515_v34 = vpop.f32.mrf.mxu1 }
 0x1cb   :  { %533 = vmatmul.mubr.bf16.vlgmr.msra.gmra.mxu0 %v264_v33 }
 0x28b   :  { %v299_v37 = vpop.f32.mrf.mxu0 }
 0x28c   :  { %v300_v38 = vadd.f32 %v440_v27, %v299_v37 }
 0x28d   :  { %v534_v39 = vpop.f32.mrf.mxu0 }
 0x28e   :  { %v305_v40 = vmax.f32 %v300_v38, 0.0 }
 0x28f   :  { %v302_v41 = vpop.f32.mrf.mxu0 }
 0x290   :  { %v306_v42 = vpack.c.bf16 %v305_v40, %v305_v40 }
 0x291   :  { %v535_v43 = vpop.f32.mrf.mxu0 }
 0x292   :  { %553 = vmatmul.mubr.bf16.vlgmr.msra.gmra.mxu1 %v306_v42 }
 0x352   :  { %v412_v45 = vpop.f32.mrf.mxu1 }
 0x353   :  { %v413_v46 = vadd.f32 %v449_v44, %v412_v45 }
 0x354   :  { %v554_v47 = vpop.f32.mrf.mxu1 }
 0x355   :  { %418 = vst [vmem:[#allocation10] sm:$0xff] %v413_v46 }
 0x356   :  { %v415_v48 = vpop.f32.mrf.mxu1 }
 0x357   :  { %674 = shalt.err (!%p671_p10)
}
 0x358   :  { %428 = dma.vmem_to_hbm [thread:$0]  %s426_s24, 128, %s814_s7, [#allocation4]   ;;  %v555_v49 = vpop.f32.mrf.mxu1 }
 0x359   :  { %689 = dma.done.wait [#allocation4], 128  }
 0x35a   :  { %690 = vsyncadd [#allocation4], 4294967168 }
 0x35b   :  { %432 = vsyncpa [#allocation3], 1 }
 0x35c   :  { %433 = vsyncpa [#allocation6], 1 }
 0x35d   :  { %434 = vsyncpa [#allocation9], 1 }
 0x35e   :  { %435 = vsyncpa [#allocation4], 1 }

</bundles_post_ra>
